<compile_context>
chip_gen: v6e
topology: v6e:2x2x1
jax: 0.10.0
libtpu: 0.0.40
codegen_flags: <defaults>
</compile_context>

<pallas_src>
import functools

import jax
import jax.numpy as jnp
from jax.experimental import pallas as pl
from jax.experimental.pallas import tpu as pltpu

LANE = 128
SUBLANE = 8
# 512x128 f32 block = 256 KiB per input; ~3 MiB total double-buffered,
# comfortably inside the v7x 32 MiB scoped-VMEM default (and v5e/v6e).
MAX_BLOCK_ROWS = 512


def _log_sigmoid(x):
    # numerically stable log(sigmoid(x)) = min(x, 0) - log1p(exp(-|x|))
    return jnp.minimum(x, 0.0) - jnp.log1p(jnp.exp(-jnp.abs(x)))


def _dpo_kernel(pc_ref, pr_ref, rc_ref, rr_ref,
                partial_ref, cr_ref, rj_ref,
                *, beta, label_smoothing, ipo, use_identity,
                batch, tile_rows, need_mask):
    pc = pc_ref[...].astype(jnp.float32)
    pr = pr_ref[...].astype(jnp.float32)
    rc = rc_ref[...].astype(jnp.float32)
    rr = rr_ref[...].astype(jnp.float32)

    logits = (pc - pr) - (rc - rr)

    # Branch selection is static (Python-level), mirroring the nn.Module flags.
    if ipo:
        losses = (logits - 1.0 / (2.0 * beta)) ** 2
    elif use_identity:
        losses = -logits
    elif label_smoothing == 0.0:
        # Common case: one log-sigmoid instead of two (halves EUP pressure).
        losses = -_log_sigmoid(beta * logits)
    else:
        losses = (-_log_sigmoid(beta * logits) * (1.0 - label_smoothing)
                  - _log_sigmoid(-beta * logits) * label_smoothing)

    if need_mask:
        # Mask padded tail elements out of the loss sum.
        row = jax.lax.broadcasted_iota(jnp.int32, losses.shape, 0)
        lane = jax.lax.broadcasted_iota(jnp.int32, losses.shape, 1)
        start_row = pl.program_id(0) * tile_rows
        idx = (start_row + row) * LANE + lane
        losses = jnp.where(idx < batch, losses, 0.0)

    # Per-block partial sums reduced to a dense (8, 128) tile (unmasked store);
    # the wrapper finishes the reduction.  Keeps the grid axis "parallel".
    partial_ref[...] = losses.reshape(
        tile_rows // SUBLANE, SUBLANE, LANE).sum(axis=0)

    # Rewards written back in the input dtype (cast in the epilogue).
    cr_ref[...] = (beta * (pc - rc)).astype(cr_ref.dtype)
    rj_ref[...] = (beta * (pr - rr)).astype(rj_ref.dtype)


def dpo_loss(policy_chosen_logps,
             policy_rejected_logps,
             reference_chosen_logps,
             reference_rejected_logps,
             *, beta, label_smoothing=0.0, ipo=False, use_identity=False):
    """JAX/Pallas equivalent of DPOLoss.forward.

    Inputs: four (B,) float arrays (any float dtype).
    Returns: (scalar f32 loss, chosen_rewards (B,), rejected_rewards (B,)),
    rewards in the input dtype.
    """
    b = policy_chosen_logps.shape[0]
    dtype = policy_chosen_logps.dtype

    # Choose a lane/sublane-dense (rows, 128) tiling with bounded padding.
    rows = -(-b // LANE)
    rows8 = -(-rows // SUBLANE) * SUBLANE
    if rows8 <= MAX_BLOCK_ROWS:
        tile_rows = rows8
    else:
        # keep padding overhead small (<~1/8 of the data) while <= cap
        tile_rows = min(MAX_BLOCK_ROWS,
                        max(SUBLANE, (rows8 // 8) // SUBLANE * SUBLANE))
    rows_padded = -(-rows8 // tile_rows) * tile_rows
    padded_b = rows_padded * LANE
    grid_n = rows_padded // tile_rows
    need_mask = padded_b != b

    def prep(x):
        if need_mask:
            x = jnp.pad(x, (0, padded_b - b))
        return x.reshape(rows_padded, LANE)  # native dtype, no up-cast

    ins = [prep(x) for x in (policy_chosen_logps, policy_rejected_logps,
                             reference_chosen_logps, reference_rejected_logps)]

    kernel = functools.partial(
        _dpo_kernel,
        beta=float(beta),
        label_smoothing=float(label_smoothing),
        ipo=bool(ipo),
        use_identity=bool(use_identity),
        batch=b,
        tile_rows=tile_rows,
        need_mask=need_mask,
    )

    vec_spec = pl.BlockSpec((tile_rows, LANE), lambda i: (i, 0))
    partial_spec = pl.BlockSpec((SUBLANE, LANE), lambda i: (i, 0))

    partials, chosen_rewards, rejected_rewards = pl.pallas_call(
        kernel,
        grid=(grid_n,),
        in_specs=[vec_spec, vec_spec, vec_spec, vec_spec],
        out_specs=(partial_spec, vec_spec, vec_spec),
        out_shape=(
            jax.ShapeDtypeStruct((grid_n * SUBLANE, LANE), jnp.float32),
            jax.ShapeDtypeStruct((rows_padded, LANE), dtype),
            jax.ShapeDtypeStruct((rows_padded, LANE), dtype),
        ),
        compiler_params=pltpu.CompilerParams(
            dimension_semantics=("parallel",)),  # both TensorCores on v7x
    )(*ins)

    loss = jnp.sum(partials) / b
    chosen_rewards = chosen_rewards.reshape(-1)[:b]
    rejected_rewards = rejected_rewards.reshape(-1)[:b]
    return loss, chosen_rewards, rejected_rewards


if __name__ == "__main__":
    key = jax.random.PRNGKey(0)
    k1, k2, k3, k4 = jax.random.split(key, 4)
    B = 8
    # log-probabilities are negative reals
    pc = -jnp.abs(jax.random.normal(k1, (B,), jnp.float32)) * 5.0
    pr = -jnp.abs(jax.random.normal(k2, (B,), jnp.float32)) * 5.0
    rc = -jnp.abs(jax.random.normal(k3, (B,), jnp.float32)) * 5.0
    rr = -jnp.abs(jax.random.normal(k4, (B,), jnp.float32)) * 5.0

    beta = 0.1

    def ref_fn(pc, pr, rc, rr, beta, label_smoothing=0.0, ipo=False,
               use_identity=False):
        logits = (pc - pr) - (rc - rr)
        if ipo:
            losses = (logits - 1.0 / (2.0 * beta)) ** 2
        elif use_identity:
            losses = -logits
        else:
            losses = (-jax.nn.log_sigmoid(beta * logits) * (1.0 - label_smoothing)
                      - jax.nn.log_sigmoid(-beta * logits) * label_smoothing)
        return losses.mean(), beta * (pc - rc), beta * (pr - rr)

    def check(out, ref, atol=1e-5, rtol=1e-5):
        for o, r in zip(out, ref):
            assert jnp.allclose(jnp.asarray(o, jnp.float32),
                                jnp.asarray(r, jnp.float32),
                                atol=atol, rtol=rtol)

    # default sigmoid branch (label_smoothing == 0 specialization)
    out = dpo_loss(pc, pr, rc, rr, beta=beta)
    jax.block_until_ready(out)
    check(out, ref_fn(pc, pr, rc, rr, beta))

    # label-smoothing branch
    out = dpo_loss(pc, pr, rc, rr, beta=beta, label_smoothing=0.1)
    jax.block_until_ready(out)
    check(out, ref_fn(pc, pr, rc, rr, beta, label_smoothing=0.1))

    # ipo branch
    out = dpo_loss(pc, pr, rc, rr, beta=beta, ipo=True)
    jax.block_until_ready(out)
    check(out, ref_fn(pc, pr, rc, rr, beta, ipo=True))

    # bf16 inputs: dtype-native I/O (rewards come back as bf16)
    bf = [x.astype(jnp.bfloat16) for x in (pc, pr, rc, rr)]
    out = dpo_loss(*bf, beta=beta)
    jax.block_until_ready(out)
    assert out[1].dtype == jnp.bfloat16 and out[2].dtype == jnp.bfloat16
    ref = ref_fn(*[x.astype(jnp.float32) for x in bf], beta)
    check(out, ref, atol=2e-2, rtol=2e-2)

    print("KERNEL_OK")
</pallas_src>

<mosaic_0001>
module attributes {stable_mosaic.version = 11 : i64} {
  func.func @_dpo_kernel(%arg0: i32, %arg1: memref<8x128xf32, #tpu.memory_space<vmem>>, %arg2: memref<8x128xf32, #tpu.memory_space<vmem>>, %arg3: memref<8x128xf32, #tpu.memory_space<vmem>>, %arg4: memref<8x128xf32, #tpu.memory_space<vmem>>, %arg5: memref<8x128xf32, #tpu.memory_space<vmem>>, %arg6: memref<8x128xf32, #tpu.memory_space<vmem>>, %arg7: memref<8x128xf32, #tpu.memory_space<vmem>>) attributes {dimension_semantics = [#tpu.dimension_semantics<parallel>], iteration_bounds = array<i64: 1>, scalar_prefetch = 0 : i64, scratch_operands = 0 : i64, tpu.core_type = #tpu.core_type<tc>, window_params = [{transform_indices = @transform_0, window_bounds = array<i64: 8, 128>}, {transform_indices = @transform_1, window_bounds = array<i64: 8, 128>}, {transform_indices = @transform_2, window_bounds = array<i64: 8, 128>}, {transform_indices = @transform_3, window_bounds = array<i64: 8, 128>}, {transform_indices = @transform_4, window_bounds = array<i64: 8, 128>}, {transform_indices = @transform_5, window_bounds = array<i64: 8, 128>}, {transform_indices = @transform_6, window_bounds = array<i64: 8, 128>}]} {
    %c0 = arith.constant 0 : index
    %c0_0 = arith.constant 0 : index
    %0 = vector.load %arg1[%c0, %c0_0] : memref<8x128xf32, #tpu.memory_space<vmem>>, vector<8x128xf32>
    %c0_1 = arith.constant 0 : index
    %c0_2 = arith.constant 0 : index
    %1 = vector.load %arg2[%c0_1, %c0_2] : memref<8x128xf32, #tpu.memory_space<vmem>>, vector<8x128xf32>
    %c0_3 = arith.constant 0 : index
    %c0_4 = arith.constant 0 : index
    %2 = vector.load %arg3[%c0_3, %c0_4] : memref<8x128xf32, #tpu.memory_space<vmem>>, vector<8x128xf32>
    %c0_5 = arith.constant 0 : index
    %c0_6 = arith.constant 0 : index
    %3 = vector.load %arg4[%c0_5, %c0_6] : memref<8x128xf32, #tpu.memory_space<vmem>>, vector<8x128xf32>
    %4 = arith.subf %0, %1 : vector<8x128xf32>
    %5 = arith.subf %2, %3 : vector<8x128xf32>
    %6 = arith.subf %4, %5 : vector<8x128xf32>
    %cst = arith.constant 1.000000e-01 : f32
    %7 = vector.broadcast %cst : f32 to vector<8x128xf32>
    %8 = arith.mulf %7, %6 : vector<8x128xf32>
    %cst_7 = arith.constant 0.000000e+00 : f32
    %9 = vector.broadcast %cst_7 : f32 to vector<8x128xf32>
    %10 = arith.minimumf %8, %9 : vector<8x128xf32>
    %11 = math.absf %8 : vector<8x128xf32>
    %cst_8 = arith.constant 0.000000e+00 : f32
    %12 = vector.broadcast %cst_8 : f32 to vector<8x128xf32>
    %13 = arith.subf %12, %11 : vector<8x128xf32>
    %14 = math.exp %13 : vector<8x128xf32>
    %15 = math.log1p %14 : vector<8x128xf32>
    %16 = arith.subf %10, %15 : vector<8x128xf32>
    %cst_9 = arith.constant 0.000000e+00 : f32
    %17 = vector.broadcast %cst_9 : f32 to vector<8x128xf32>
    %18 = arith.subf %17, %16 : vector<8x128xf32>
    %19 = tpu.iota {dimensions = array<i32: 0>} : vector<8x128xi32>
    %20 = tpu.iota {dimensions = array<i32: 1>} : vector<8x128xi32>
    %c8_i32 = arith.constant 8 : i32
    %21 = arith.muli %arg0, %c8_i32 : i32
    %22 = vector.broadcast %21 : i32 to vector<8x128xi32>
    %23 = arith.addi %22, %19 : vector<8x128xi32>
    %c128_i32 = arith.constant 128 : i32
    %24 = vector.broadcast %c128_i32 : i32 to vector<8x128xi32>
    %25 = arith.muli %23, %24 : vector<8x128xi32>
    %26 = arith.addi %25, %20 : vector<8x128xi32>
    %c8_i32_10 = arith.constant 8 : i32
    %27 = vector.broadcast %c8_i32_10 : i32 to vector<8x128xi32>
    %28 = arith.cmpi slt, %26, %27 : vector<8x128xi32>
    %cst_11 = arith.constant 0.000000e+00 : f32
    %29 = vector.broadcast %cst_11 : f32 to vector<8x128xf32>
    %30 = arith.select %28, %18, %29 : vector<8x128xi1>, vector<8x128xf32>
    %31 = vector.shape_cast %30 : vector<8x128xf32> to vector<1x8x128xf32>
    %cst_12 = arith.constant dense<0.000000e+00> : vector<8x128xf32>
    %32 = vector.multi_reduction <add>, %31, %cst_12 [0] : vector<1x8x128xf32> to vector<8x128xf32>
    %c0_13 = arith.constant 0 : index
    %c0_14 = arith.constant 0 : index
    %33 = vector.load %arg5[%c0_13, %c0_14] : memref<8x128xf32, #tpu.memory_space<vmem>>, vector<8x128xf32>
    tpu.vector_store %arg5[%c0_13, %c0_14], %32 {strides = array<i32>} : memref<8x128xf32, #tpu.memory_space<vmem>>, vector<8x128xf32>,
    %34 = arith.subf %0, %2 : vector<8x128xf32>
    %cst_15 = arith.constant 1.000000e-01 : f32
    %35 = vector.broadcast %cst_15 : f32 to vector<8x128xf32>
    %36 = arith.mulf %35, %34 : vector<8x128xf32>
    %c0_16 = arith.constant 0 : index
    %c0_17 = arith.constant 0 : index
    %37 = vector.load %arg6[%c0_16, %c0_17] : memref<8x128xf32, #tpu.memory_space<vmem>>, vector<8x128xf32>
    tpu.vector_store %arg6[%c0_16, %c0_17], %36 {strides = array<i32>} : memref<8x128xf32, #tpu.memory_space<vmem>>, vector<8x128xf32>,
    %38 = arith.subf %1, %3 : vector<8x128xf32>
    %cst_18 = arith.constant 1.000000e-01 : f32
    %39 = vector.broadcast %cst_18 : f32 to vector<8x128xf32>
    %40 = arith.mulf %39, %38 : vector<8x128xf32>
    %c0_19 = arith.constant 0 : index
    %c0_20 = arith.constant 0 : index
    %41 = vector.load %arg7[%c0_19, %c0_20] : memref<8x128xf32, #tpu.memory_space<vmem>>, vector<8x128xf32>
    tpu.vector_store %arg7[%c0_19, %c0_20], %40 {strides = array<i32>} : memref<8x128xf32, #tpu.memory_space<vmem>>, vector<8x128xf32>,
    return
  }
  func.func @transform_0(%arg0: i32) -> (i32, i32) {
    %c0_i32 = arith.constant 0 : i32
    %c0_i32_0 = arith.constant 0 : i32
    return %arg0, %c0_i32 : i32, i32
  }
  func.func @transform_1(%arg0: i32) -> (i32, i32) {
    %c0_i32 = arith.constant 0 : i32
    %c0_i32_0 = arith.constant 0 : i32
    return %arg0, %c0_i32 : i32, i32
  }
  func.func @transform_2(%arg0: i32) -> (i32, i32) {
    %c0_i32 = arith.constant 0 : i32
    %c0_i32_0 = arith.constant 0 : i32
    return %arg0, %c0_i32 : i32, i32
  }
  func.func @transform_3(%arg0: i32) -> (i32, i32) {
    %c0_i32 = arith.constant 0 : i32
    %c0_i32_0 = arith.constant 0 : i32
    return %arg0, %c0_i32 : i32, i32
  }
  func.func @transform_4(%arg0: i32) -> (i32, i32) {
    %c0_i32 = arith.constant 0 : i32
    %c0_i32_0 = arith.constant 0 : i32
    return %arg0, %c0_i32 : i32, i32
  }
  func.func @transform_5(%arg0: i32) -> (i32, i32) {
    %c0_i32 = arith.constant 0 : i32
    %c0_i32_0 = arith.constant 0 : i32
    return %arg0, %c0_i32 : i32, i32
  }
  func.func @transform_6(%arg0: i32) -> (i32, i32) {
    %c0_i32 = arith.constant 0 : i32
    %c0_i32_0 = arith.constant 0 : i32
    return %arg0, %c0_i32 : i32, i32
  }
}

</mosaic_0001>

<bundles_post_ra>
// kernel: tpu_custom_call.1
= control target key start
LH: loop header
LB: loop body
LE: loop exit
PB: predicated region body
PF: predicated region fallthrough
CT: control target
= control target key end

     0   :  { %12 = vsyncpa [#allocation3], 0  ;;  %s380_s0 = inlined_call_operand.hbm [shape: f32[8,128], index: 0, kind: input, shape index: {}]   ;;  %s381_s1 = inlined_call_operand.hbm [shape: f32[8,128], index: 1, kind: input, shape index: {}]   ;;  %s382_s2 = inlined_call_operand.hbm [shape: f32[8,128], index: 2, kind: input, shape index: {}]   ;;  %s383_s3 = inlined_call_operand.hbm [shape: f32[8,128], index: 3, kind: input, shape index: {}]   ;;  %s384_s4 = inlined_call_operand.hbm [shape: f32[8,128], index: 4, kind: output, shape index: {0}]   ;;  %s385_s5 = inlined_call_operand.hbm [shape: f32[8,128], index: 5, kind: output, shape index: {1}]   ;;  %s386_s6 = inlined_call_operand.hbm [shape: f32[8,128], index: 6, kind: output, shape index: {2}]  }
   0x1   :  { %13 = vsyncpa [#allocation6], 0 }
   0x2   :  { %14 = vsyncpa [#allocation9], 0 }
   0x3   :  { %15 = vsyncpa [#allocation4], 0 }
   0x4   :  { %16 = vsyncpa [#allocation12], 0  ;;  %s317_s21 = smov [#allocation5]   ;;  %s318_s23 = smov [#allocation2]  }
   0x5   :  { %s33_s22 = sshll.u32 %s317_s21, 4  ;;  %s23_s24 = sshll.u32 %s318_s23, 4  ;;  %s34_s22 = int_to_ptr.vmem [resolvable:$true] %s33_s22  ;;  %s24_s24 = int_to_ptr.vmem [resolvable:$true] %s23_s24 }
   0x6   :  { %s175_s25 = scalar_lea.vmem %s34_s22, 128  ;;  %p180_p1 = scmp.lt.s32.totalorder %s34_s22, %s34_s22 }
   0x7   :  { %p176_p0 = scmp.ne.s32.totalorder %s34_s22, %s175_s25  ;;  %p181_p2 = scmp.lt.s32.totalorder %s175_s25, %s175_s25 }
   0x9   :  { %p182_p3 = por %p181_p2, %p180_p1 }
   0xb   :  { %p183_p4 = pnand %p182_p3, %p176_p0 }
   0xd   :  { %186 = shalt.err (!%p183_p4)
}
   0xe   :  { %36 = dma.hbm_to_vmem [thread:$0]  %s381_s1, 128, %s34_s22, [#allocation6]  }
   0xf   :  { %s195_s28 = scalar_lea.vmem %s24_s24, 128  ;;  %p200_p6 = scmp.lt.s32.totalorder %s24_s24, %s24_s24 }
  0x10   :  { %p196_p5 = scmp.ne.s32.totalorder %s24_s24, %s195_s28  ;;  %p201_p7 = scmp.lt.s32.totalorder %s195_s28, %s195_s28 }
  0x12   :  { %p202_p8 = por %p201_p7, %p200_p6 }
  0x14   :  { %p203_p9 = pnand %p202_p8, %p196_p5 }
  0x16   :  { %206 = shalt.err (!%p203_p9)
}
  0x17   :  { %26 = dma.hbm_to_vmem [thread:$0]  %s380_s0, 128, %s24_s24, [#allocation3]  }
  0x18   :  { %s319_s7 = smov [#allocation7]   ;;  %s320_s9 = smov [#allocation8]  }
  0x19   :  { %s43_s8 = sshll.u32 %s319_s7, 4  ;;  %s53_s10 = sshll.u32 %s320_s9, 4  ;;  %s44_s8 = int_to_ptr.vmem [resolvable:$true] %s43_s8  ;;  %s54_s10 = int_to_ptr.vmem [resolvable:$true] %s53_s10 }
  0x1a   :  { %s215_s11 = scalar_lea.vmem %s44_s8, 128  ;;  %p220_p11 = scmp.lt.s32.totalorder %s44_s8, %s44_s8 }
  0x1b   :  { %p216_p10 = scmp.ne.s32.totalorder %s44_s8, %s215_s11  ;;  %p221_p12 = scmp.lt.s32.totalorder %s215_s11, %s215_s11 }
  0x1d   :  { %p222_p13 = por %p221_p12, %p220_p11 }
  0x1f   :  { %p223_p0 = pnand %p222_p13, %p216_p10 }
  0x21   :  { %226 = shalt.err (!%p223_p0)
}
  0x22   :  { %46 = dma.hbm_to_vmem [thread:$0]  %s382_s2, 128, %s44_s8, [#allocation6]  }
  0x23   :  { %s235_s13 = scalar_lea.vmem %s54_s10, 128  ;;  %p240_p2 = scmp.lt.s32.totalorder %s54_s10, %s54_s10 }
  0x24   :  { %p236_p1 = scmp.ne.s32.totalorder %s54_s10, %s235_s13  ;;  %p241_p3 = scmp.lt.s32.totalorder %s235_s13, %s235_s13 }
  0x26   :  { %p242_p4 = por %p241_p3, %p240_p2 }
  0x28   :  { %p243_p5 = pnand %p242_p4, %p236_p1 }
  0x2a   :  { %246 = shalt.err (!%p243_p5)
}
  0x2b   :  { %56 = dma.hbm_to_vmem [thread:$0]  %s383_s3, 128, %s54_s10, [#allocation9]  }
  0x2c   :  { %307 = dma.done.wait [#allocation3], 128  }
  0x2d   :  { %308 = vsyncadd [#allocation3], 4294967168 }
  0x2e   :  { %309 = dma.done.wait [#allocation6], 256  }
  0x2f   :  { %310 = vsyncadd [#allocation6], 4294967040 }
  0x30   :  { %311 = dma.done.wait [#allocation9], 128  }
  0x31   :  { %312 = vsyncadd [#allocation9], 4294967168  ;;  %v69_v0 = vld [vmem:[#allocation2] sm:$0xff]  ;;  %v70_v1 = vld [vmem:[#allocation5] sm:$0xff]  ;;  %s321_s2 = smov [#allocation11]   ;;  %s322_s16 = smov [#allocation13]  }
  0x32   :  { %v71_v2 = vld [vmem:[#allocation7] sm:$0xff]  ;;  %s128_s15 = sshll.u32 %s321_s2, 4  ;;  %v72_v3 = vld [vmem:[#allocation8] sm:$0xff]  ;;  %v73_v4 = vsub.f32 %v69_v0, %v70_v1  ;;  %s138_s17 = sshll.u32 %s322_s16, 4  ;;  %s129_s15 = int_to_ptr.vmem [resolvable:$true] %s128_s15  ;;  %s139_s17 = int_to_ptr.vmem [resolvable:$true] %s138_s17 }
  0x33   :  { %v106_v5 = vsub.f32 %v69_v0, %v71_v2  ;;  %v74_v6 = vsub.f32 %v71_v2, %v72_v3  ;;  %v109_v7 = vsub.f32 %v70_v1, %v72_v3  ;;  %s247_s3 = scalar_lea.vmem %s129_s15, 128  ;;  %p252_p7 = scmp.lt.s32.totalorder %s129_s15, %s129_s15 }
  0x34   :  { %p248_p6 = scmp.ne.s32.totalorder %s129_s15, %s247_s3  ;;  %p253_p8 = scmp.lt.s32.totalorder %s247_s3, %s247_s3 }
  0x35   :  { %v107_v8 = vmul.f32 0.1, %v106_v5  ;;  %v75_v9 = vsub.f32 %v73_v4, %v74_v6  ;;  %v110_v10 = vmul.f32 0.1, %v109_v7 }
  0x36   :  { %p254_p9 = por %p253_p8, %p252_p7 }
  0x37   :  { %108 = vst [vmem:[#allocation11] sm:$0xff] %v107_v8  ;;  %v76_v11 = vmul.f32 0.1, %v75_v9  ;;  %111 = vst [vmem:[#allocation13] sm:$0xff] %v110_v10 }
  0x38   :  { %p255_p10 = pnand %p254_p9, %p248_p6 }
  0x3a   :  { %258 = shalt.err (!%p255_p10)
}
  0x3b   :  { %131 = dma.vmem_to_hbm [thread:$0]  %s129_s15, 128, %s385_s5, [#allocation12]  }
  0x3c   :  { %s267_s20 = scalar_lea.vmem %s139_s17, 128  ;;  %p272_p12 = scmp.lt.s32.totalorder %s139_s17, %s139_s17 }
  0x3d   :  { %p268_p11 = scmp.ne.s32.totalorder %s139_s17, %s267_s20  ;;  %p273_p13 = scmp.lt.s32.totalorder %s267_s20, %s267_s20 }
  0x3f   :  { %p274_p0 = por %p273_p13, %p272_p12 }
  0x41   :  { %p275_p1 = pnand %p274_p0, %p268_p11 }
  0x43   :  { %278 = shalt.err (!%p275_p1)
}
  0x44   :  { %141 = dma.vmem_to_hbm [thread:$0]  %s139_s17, 128, %s386_s6, [#allocation12]   ;;  %v78_v12 = vand.u32 2147483647, %v76_v11  ;;  %v93_v17 = vlaneseq  ;;  %v77_v26 = vmin.f32 %v76_v11, 0.0 }
  0x45   :  { %s323_s5 = smov [#allocation10]  }
  0x46   :  { %v79_v13 = vsub.f32 0.0, %v78_v12  ;;  %v94_v19 = vshrl.u32 %v93_v17, 7  ;;  %v96_v22 = vand.u32 127, %v93_v17  ;;  %s118_s6 = sshll.u32 %s323_s5, 4  ;;  %s119_s6 = int_to_ptr.vmem [resolvable:$true] %s118_s6 }
  0x47   :  { %s287_s23 = scalar_lea.vmem %s119_s6, 128  ;;  %p292_p3 = scmp.lt.s32.totalorder %s119_s6, %s119_s6 }
  0x48   :  { %v80_v14 = vmul.f32 1.442695, %v79_v13  ;;  %v100_v23 = vmul.u32 128, %v94_v19  ;;  %p288_p2 = scmp.ne.s32.totalorder %s119_s6, %s287_s23  ;;  %p293_p4 = scmp.lt.s32.totalorder %s287_s23, %s287_s23 }
  0x4a   :  { %163 = vpow2.f32 %v80_v14  ;;  %v101_v28 = vadd.s32 %v100_v23, %v96_v22  ;;  %p294_p5 = por %p293_p4, %p292_p3 }
  0x4c   :  { %vm102_vm1 = vcmp.lt.s32.totalorder %v101_v28, 8  ;;  %p295_p6 = pnand %p294_p5, %p288_p2 }
  0x57   :  { %v164_v15 = vpop.eup %163 }
  0x58   :  { %v82_v16 = vadd.f32 1.0, %v164_v15  ;;  %v85_v18 = vmul.f32 -0.5, %v164_v15  ;;  %v88_v21 = vand.u32 2147483647, %v164_v15 }
  0x5a   :  { %165 = vlog2.f32 %v82_v16  ;;  %v86_v20 = vadd.f32 1.0, %v85_v18  ;;  %vm89_vm0 = vcmp.lt.f32.partialorder %v88_v21, 0.0004427343 }
  0x5c   :  { %v87_v24 = vmul.f32 %v164_v15, %v86_v20 }
  0x67   :  { %v166_v25 = vpop.eup %165 }
  0x68   :  { %v84_v27 = vmul.f32 0.6931472, %v166_v25 }
  0x6a   :  { %v90_v29 = vsel %vm89_vm0, %v87_v24, %v84_v27 }
  0x6b   :  { %v91_v30 = vsub.f32 %v77_v26, %v90_v29 }
  0x6d   :  { %v92_v31 = vsub.f32 0.0, %v91_v30 }
  0x6f   :  { %v103_v32 = vsel %vm102_vm1, %v92_v31, 0.0 }
  0x70   :  { %105 = vst [vmem:[#allocation10] sm:$0xff] %v103_v32 }
  0x71   :  { %298 = shalt.err (!%p295_p6)
}
  0x72   :  { %121 = dma.vmem_to_hbm [thread:$0]  %s119_s6, 128, %s384_s4, [#allocation4]  }
  0x73   :  { %313 = dma.done.wait [#allocation4], 128  }
  0x74   :  { %314 = vsyncadd [#allocation4], 4294967168 }
  0x75   :  { %315 = dma.done.wait [#allocation12], 256  }
  0x76   :  { %316 = vsyncadd [#allocation12], 4294967040 }
  0x77   :  { %151 = vsyncpa [#allocation3], 1 }
  0x78   :  { %152 = vsyncpa [#allocation6], 1 }
  0x79   :  { %153 = vsyncpa [#allocation9], 1 }
  0x7a   :  { %154 = vsyncpa [#allocation4], 1 }
  0x7b   :  { %155 = vsyncpa [#allocation12], 1 }

</bundles_post_ra>
